<compile_context>
chip_gen: v7x
topology: tpu7x:2x2x1
jax: 0.10.0
libtpu: 0.0.40
codegen_flags: <defaults>
</compile_context>

<pallas_src>
import functools

import jax
import jax.numpy as jnp
from jax import lax
from jax.experimental import pallas as pl
from jax.experimental.pallas import tpu as pltpu

LOG_STD_MIN = -20.0
LOG_STD_MAX = 2.0

_LANES = 128
_BF16_SUBLANES = 16  # bf16 min tile is (16, 128)


def _round_up(x, m):
    return (x + m - 1) // m * m


def _vmem_capacity_bytes():
    """Physical VMEM per TensorCore (v5e/v6e: 128 MiB, v7x: 64 MiB)."""
    try:
        cap = getattr(pltpu.get_tpu_info(), "vmem_capacity_bytes", None)
        if cap:
            return int(cap)
    except Exception:
        pass
    return 64 << 20  # conservative default (v7x per-TC VMEM)


def _policy_kernel(num_actions,
                   x_ref,
                   w1_ref, b1_ref,
                   w2_ref, b2_ref,
                   w3_ref, b3_ref,
                   w4_ref, b4_ref,
                   wh_ref, bh_ref,
                   out_ref):
    """One batch tile of the SAC PolicyNetwork forward pass."""

    def layer(h, w_ref, b_ref):
        # bf16 x bf16 -> f32 accumulate on the MXU; bias/ReLU in f32 on VPU.
        z = jnp.dot(h, w_ref[...], preferred_element_type=jnp.float32)
        z = z + b_ref[...]
        return jnp.maximum(z, 0.0).astype(jnp.bfloat16)

    h = x_ref[...]                       # bf16 [Bt, I]
    h = layer(h, w1_ref, b1_ref)
    h = layer(h, w2_ref, b2_ref)
    h = layer(h, w3_ref, b3_ref)
    h = layer(h, w4_ref, b4_ref)

    # Fused (mean | log_std | zero-pad) head -> single lane-dense output slab.
    z = jnp.dot(h, wh_ref[...], preferred_element_type=jnp.float32) + bh_ref[...]

    # Clip only the log_std columns [A, 2A); mean and zero-pad pass through.
    col = lax.broadcasted_iota(jnp.int32, z.shape, 1)
    is_log_std = (col >= num_actions) & (col < 2 * num_actions)
    z = jnp.where(is_log_std, jnp.clip(z, LOG_STD_MIN, LOG_STD_MAX), z)

    # bf16 writeback: halves output HBM traffic (wrapper upcasts after slicing).
    out_ref[...] = z.astype(out_ref.dtype)


def prepare_params(params):
    """One-time packing, OUTSIDE the per-forward hot path.

    Fuses the mean / log_std heads into one lane-padded bf16 weight/bias and
    casts the trunk to bf16 (f32 biases).  Call once and reuse the result.
    """
    H = params["w1"].shape[1]
    A = params["wm"].shape[1]
    Hp = _round_up(2 * A, _LANES)        # lane-dense fused head width

    wh = jnp.zeros((H, Hp), jnp.bfloat16)
    wh = wh.at[:, :A].set(params["wm"].astype(jnp.bfloat16))
    wh = wh.at[:, A:2 * A].set(params["ws"].astype(jnp.bfloat16))
    bh = jnp.zeros((1, Hp), jnp.float32)
    bh = bh.at[:, :A].set(params["bm"].astype(jnp.float32))
    bh = bh.at[:, A:2 * A].set(params["bs"].astype(jnp.float32))

    return dict(
        w1=params["w1"].astype(jnp.bfloat16), b1=params["b1"].astype(jnp.float32),
        w2=params["w2"].astype(jnp.bfloat16), b2=params["b2"].astype(jnp.float32),
        w3=params["w3"].astype(jnp.bfloat16), b3=params["b3"].astype(jnp.float32),
        w4=params["w4"].astype(jnp.bfloat16), b4=params["b4"].astype(jnp.float32),
        wh=wh, bh=bh)


@functools.partial(jax.jit, static_argnames=("num_actions", "block_b"))
def policy_forward(state, prep, num_actions, block_b=512):
    """PolicyNetwork forward. state: [B, num_inputs] f32 -> (mean, log_std) f32."""
    B, num_inputs = state.shape
    H = prep["w1"].shape[1]
    Hp = prep["wh"].shape[1]
    A = num_actions

    # ---- batch tiling:
    #  * multiple of 16 sublanes (bf16 min tile),
    #  * at least 2 grid steps when the batch allows it so v7x's two
    #    TensorCores both get work on the "parallel" axis,
    #  * capped at block_b (tiles are tiny in VMEM, so prefer big tiles).
    bt = min(block_b, _round_up(pl.cdiv(max(B, 1), 2), _BF16_SUBLANES))
    bt = max(bt, _BF16_SUBLANES)
    Bp = _round_up(B, bt)
    x = state.astype(jnp.bfloat16)
    if Bp != B:
        x = jnp.pad(x, ((0, Bp - B), (0, 0)))

    grid = (Bp // bt,)

    args = (x,
            prep["w1"], prep["b1"], prep["w2"], prep["b2"],
            prep["w3"], prep["b3"], prep["w4"], prep["b4"],
            prep["wh"], prep["bh"])

    # Weights/biases: full-array blocks, constant index_map (DMA'd once,
    # resident across all batch tiles), single-buffered — a second buffer for
    # a constant-index block never overlaps anything and just burns VMEM
    # (critical on v7x's 64 MiB).
    # TODO(synk): for very large H (>~2.5k on v7x) even single-buffered
    # resident weights no longer fit; tile the HxH layers over output columns
    # with an extra "arbitrary" grid axis instead of keeping them resident.
    in_specs = [pl.BlockSpec((bt, num_inputs), lambda i: (i, 0))]
    in_specs += [
        pl.BlockSpec(a.shape, lambda i: (0, 0), pipeline_mode=pl.Buffered(1))
        for a in args[1:]
    ]
    out_specs = pl.BlockSpec((bt, Hp), lambda i: (i, 0))

    # ---- scheduler / VMEM hints
    weight_bytes = sum(int(a.size) * a.dtype.itemsize for a in args[1:])
    in_tile_bytes = bt * num_inputs * 2           # bf16 input tile
    out_tile_bytes = bt * Hp * 2                  # bf16 output tile
    vmem_limit = (weight_bytes                                  # single-buffered
                  + 2 * (in_tile_bytes + out_tile_bytes)        # double-buffered I/O
                  + (4 << 20))                                  # slack
    vmem_limit = min(int(vmem_limit), _vmem_capacity_bytes() - (8 << 20))

    flops = 2 * Bp * (num_inputs * H + 3 * H * H + H * Hp)
    bytes_accessed = Bp * num_inputs * 2 + weight_bytes + Bp * Hp * 2

    out = pl.pallas_call(
        functools.partial(_policy_kernel, A),
        out_shape=jax.ShapeDtypeStruct((Bp, Hp), jnp.bfloat16),
        grid=grid,
        in_specs=in_specs,
        out_specs=out_specs,
        compiler_params=pltpu.CompilerParams(
            dimension_semantics=("parallel",),
            vmem_limit_bytes=int(vmem_limit)),
        cost_estimate=pl.CostEstimate(
            flops=int(flops),
            transcendentals=0,
            bytes_accessed=int(bytes_accessed)),
    )(*args)

    mean = out[:B, :A].astype(jnp.float32)
    log_std = out[:B, A:2 * A].astype(jnp.float32)
    return mean, log_std


def init_params(key, num_inputs, num_actions, hidden_size, init_w=0.003):
    """Init mirroring nn.Linear defaults + uniform(-init_w, init_w) heads.

    Weights stored [in, out] in bf16 (halves weight DMA); biases in f32.
    Note: pick hidden_size as a multiple of 128 (v5e) / 256 (v6e, v7x) in real
    use — non-multiples pad the MXU contraction and waste issue slots.
    """
    keys = jax.random.split(key, 12)

    def linear(kw, kb, fan_in, fan_out):
        bound = 1.0 / jnp.sqrt(fan_in)
        w = jax.random.uniform(kw, (fan_in, fan_out), jnp.float32, -bound, bound)
        b = jax.random.uniform(kb, (1, fan_out), jnp.float32, -bound, bound)
        return w.astype(jnp.bfloat16), b

    w1, b1 = linear(keys[0], keys[1], num_inputs, hidden_size)
    w2, b2 = linear(keys[2], keys[3], hidden_size, hidden_size)
    w3, b3 = linear(keys[4], keys[5], hidden_size, hidden_size)
    w4, b4 = linear(keys[6], keys[7], hidden_size, hidden_size)

    wm = jax.random.uniform(keys[8], (hidden_size, num_actions), jnp.float32,
                            -init_w, init_w).astype(jnp.bfloat16)
    bm = jax.random.uniform(keys[9], (1, num_actions), jnp.float32,
                            -init_w, init_w)
    ws = jax.random.uniform(keys[10], (hidden_size, num_actions), jnp.float32,
                            -init_w, init_w).astype(jnp.bfloat16)
    bs = jax.random.uniform(keys[11], (1, num_actions), jnp.float32,
                            -init_w, init_w)

    return dict(w1=w1, b1=b1, w2=w2, b2=b2, w3=w3, b3=b3, w4=w4, b4=b4,
                wm=wm, bm=bm, ws=ws, bs=bs)


def policy_forward_ref(state, p):
    """Pure-JAX f32 reference (weights upcast from their stored dtype)."""
    f32 = lambda a: a.astype(jnp.float32)
    h = jax.nn.relu(state @ f32(p["w1"]) + p["b1"])
    h = jax.nn.relu(h @ f32(p["w2"]) + p["b2"])
    h = jax.nn.relu(h @ f32(p["w3"]) + p["b3"])
    h = jax.nn.relu(h @ f32(p["w4"]) + p["b4"])
    mean = h @ f32(p["wm"]) + p["bm"]
    log_std = jnp.clip(h @ f32(p["ws"]) + p["bs"], LOG_STD_MIN, LOG_STD_MAX)
    return mean, log_std


if __name__ == "__main__":
    B = 2            # batch
    NUM_INPUTS = 8   # state dim
    NUM_ACTIONS = 4
    HIDDEN = 32

    key = jax.random.PRNGKey(0)
    k_params, k_state = jax.random.split(key)

    params = init_params(k_params, NUM_INPUTS, NUM_ACTIONS, HIDDEN)
    prep = prepare_params(params)        # one-time head fusion / casts
    state = jax.random.normal(k_state, (B, NUM_INPUTS), jnp.float32)

    mean, log_std = policy_forward(state, prep, NUM_ACTIONS)
    jax.block_until_ready((mean, log_std))

    # sanity check against pure-JAX reference (bf16 weights/activations -> loose atol)
    mean_ref, log_std_ref = policy_forward_ref(state, params)
    assert mean.shape == (B, NUM_ACTIONS) and log_std.shape == (B, NUM_ACTIONS)
    assert jnp.allclose(mean, mean_ref, atol=1e-2), "mean mismatch"
    assert jnp.allclose(log_std, log_std_ref, atol=1e-2), "log_std mismatch"

    print("KERNEL_OK")
</pallas_src>

<mosaic_0001>
module attributes {stable_mosaic.version = 11 : i64} {
  func.func @_policy_kernel(%arg0: i32, %arg1: memref<16x8xbf16, #tpu.memory_space<vmem>>, %arg2: memref<8x32xbf16, #tpu.memory_space<vmem>>, %arg3: memref<1x32xf32, #tpu.memory_space<vmem>>, %arg4: memref<32x32xbf16, #tpu.memory_space<vmem>>, %arg5: memref<1x32xf32, #tpu.memory_space<vmem>>, %arg6: memref<32x32xbf16, #tpu.memory_space<vmem>>, %arg7: memref<1x32xf32, #tpu.memory_space<vmem>>, %arg8: memref<32x32xbf16, #tpu.memory_space<vmem>>, %arg9: memref<1x32xf32, #tpu.memory_space<vmem>>, %arg10: memref<32x128xbf16, #tpu.memory_space<vmem>>, %arg11: memref<1x128xf32, #tpu.memory_space<vmem>>, %arg12: memref<16x128xbf16, #tpu.memory_space<vmem>>) attributes {dimension_semantics = [#tpu.dimension_semantics<parallel>], iteration_bounds = array<i64: 1>, scalar_prefetch = 0 : i64, scratch_operands = 0 : i64, tpu.core_type = #tpu.core_type<tc>, window_params = [{transform_indices = @transform_0, window_bounds = array<i64: 16, 8>}, {pipeline_mode = #tpu.pipeline_mode<synchronous>, transform_indices = @transform_1, window_bounds = array<i64: 8, 32>}, {pipeline_mode = #tpu.pipeline_mode<synchronous>, transform_indices = @transform_2, window_bounds = array<i64: 1, 32>}, {pipeline_mode = #tpu.pipeline_mode<synchronous>, transform_indices = @transform_3, window_bounds = array<i64: 32, 32>}, {pipeline_mode = #tpu.pipeline_mode<synchronous>, transform_indices = @transform_4, window_bounds = array<i64: 1, 32>}, {pipeline_mode = #tpu.pipeline_mode<synchronous>, transform_indices = @transform_5, window_bounds = array<i64: 32, 32>}, {pipeline_mode = #tpu.pipeline_mode<synchronous>, transform_indices = @transform_6, window_bounds = array<i64: 1, 32>}, {pipeline_mode = #tpu.pipeline_mode<synchronous>, transform_indices = @transform_7, window_bounds = array<i64: 32, 32>}, {pipeline_mode = #tpu.pipeline_mode<synchronous>, transform_indices = @transform_8, window_bounds = array<i64: 1, 32>}, {pipeline_mode = #tpu.pipeline_mode<synchronous>, transform_indices = @transform_9, window_bounds = array<i64: 32, 128>}, {pipeline_mode = #tpu.pipeline_mode<synchronous>, transform_indices = @transform_10, window_bounds = array<i64: 1, 128>}, {transform_indices = @transform_11, window_bounds = array<i64: 16, 128>}]} {
    %c0 = arith.constant 0 : index
    %c0_0 = arith.constant 0 : index
    %0 = vector.load %arg1[%c0, %c0_0] : memref<16x8xbf16, #tpu.memory_space<vmem>>, vector<16x8xbf16>
    %c0_1 = arith.constant 0 : index
    %c0_2 = arith.constant 0 : index
    %1 = vector.load %arg2[%c0_1, %c0_2] : memref<8x32xbf16, #tpu.memory_space<vmem>>, vector<8x32xbf16>
    %cst = arith.constant dense<0.000000e+00> : vector<16x32xf32>
    %2 = tpu.matmul %0, %1, %cst {dimension_numbers = #tpu.dot_dimension_numbers<[1], [0], [0], [1], [0, 0, 1, 1], [], []>} : vector<16x8xbf16>, vector<8x32xbf16>, vector<16x32xf32> -> vector<16x32xf32>
    %c0_3 = arith.constant 0 : index
    %c0_4 = arith.constant 0 : index
    %3 = vector.load %arg3[%c0_3, %c0_4] : memref<1x32xf32, #tpu.memory_space<vmem>>, vector<1x32xf32>
    %4 = vector.broadcast %3 : vector<1x32xf32> to vector<16x32xf32>
    %5 = arith.addf %2, %4 : vector<16x32xf32>
    %cst_5 = arith.constant 0.000000e+00 : f32
    %6 = vector.broadcast %cst_5 : f32 to vector<16x32xf32>
    %7 = arith.maximumf %5, %6 : vector<16x32xf32>
    %8 = arith.truncf %7 : vector<16x32xf32> to vector<16x32xbf16>
    %c0_6 = arith.constant 0 : index
    %c0_7 = arith.constant 0 : index
    %9 = vector.load %arg4[%c0_6, %c0_7] : memref<32x32xbf16, #tpu.memory_space<vmem>>, vector<32x32xbf16>
    %cst_8 = arith.constant dense<0.000000e+00> : vector<16x32xf32>
    %10 = tpu.matmul %8, %9, %cst_8 {dimension_numbers = #tpu.dot_dimension_numbers<[1], [0], [0], [1], [0, 0, 1, 1], [], []>} : vector<16x32xbf16>, vector<32x32xbf16>, vector<16x32xf32> -> vector<16x32xf32>
    %c0_9 = arith.constant 0 : index
    %c0_10 = arith.constant 0 : index
    %11 = vector.load %arg5[%c0_9, %c0_10] : memref<1x32xf32, #tpu.memory_space<vmem>>, vector<1x32xf32>
    %12 = vector.broadcast %11 : vector<1x32xf32> to vector<16x32xf32>
    %13 = arith.addf %10, %12 : vector<16x32xf32>
    %cst_11 = arith.constant 0.000000e+00 : f32
    %14 = vector.broadcast %cst_11 : f32 to vector<16x32xf32>
    %15 = arith.maximumf %13, %14 : vector<16x32xf32>
    %16 = arith.truncf %15 : vector<16x32xf32> to vector<16x32xbf16>
    %c0_12 = arith.constant 0 : index
    %c0_13 = arith.constant 0 : index
    %17 = vector.load %arg6[%c0_12, %c0_13] : memref<32x32xbf16, #tpu.memory_space<vmem>>, vector<32x32xbf16>
    %cst_14 = arith.constant dense<0.000000e+00> : vector<16x32xf32>
    %18 = tpu.matmul %16, %17, %cst_14 {dimension_numbers = #tpu.dot_dimension_numbers<[1], [0], [0], [1], [0, 0, 1, 1], [], []>} : vector<16x32xbf16>, vector<32x32xbf16>, vector<16x32xf32> -> vector<16x32xf32>
    %c0_15 = arith.constant 0 : index
    %c0_16 = arith.constant 0 : index
    %19 = vector.load %arg7[%c0_15, %c0_16] : memref<1x32xf32, #tpu.memory_space<vmem>>, vector<1x32xf32>
    %20 = vector.broadcast %19 : vector<1x32xf32> to vector<16x32xf32>
    %21 = arith.addf %18, %20 : vector<16x32xf32>
    %cst_17 = arith.constant 0.000000e+00 : f32
    %22 = vector.broadcast %cst_17 : f32 to vector<16x32xf32>
    %23 = arith.maximumf %21, %22 : vector<16x32xf32>
    %24 = arith.truncf %23 : vector<16x32xf32> to vector<16x32xbf16>
    %c0_18 = arith.constant 0 : index
    %c0_19 = arith.constant 0 : index
    %25 = vector.load %arg8[%c0_18, %c0_19] : memref<32x32xbf16, #tpu.memory_space<vmem>>, vector<32x32xbf16>
    %cst_20 = arith.constant dense<0.000000e+00> : vector<16x32xf32>
    %26 = tpu.matmul %24, %25, %cst_20 {dimension_numbers = #tpu.dot_dimension_numbers<[1], [0], [0], [1], [0, 0, 1, 1], [], []>} : vector<16x32xbf16>, vector<32x32xbf16>, vector<16x32xf32> -> vector<16x32xf32>
    %c0_21 = arith.constant 0 : index
    %c0_22 = arith.constant 0 : index
    %27 = vector.load %arg9[%c0_21, %c0_22] : memref<1x32xf32, #tpu.memory_space<vmem>>, vector<1x32xf32>
    %28 = vector.broadcast %27 : vector<1x32xf32> to vector<16x32xf32>
    %29 = arith.addf %26, %28 : vector<16x32xf32>
    %cst_23 = arith.constant 0.000000e+00 : f32
    %30 = vector.broadcast %cst_23 : f32 to vector<16x32xf32>
    %31 = arith.maximumf %29, %30 : vector<16x32xf32>
    %32 = arith.truncf %31 : vector<16x32xf32> to vector<16x32xbf16>
    %c0_24 = arith.constant 0 : index
    %c0_25 = arith.constant 0 : index
    %33 = vector.load %arg10[%c0_24, %c0_25] : memref<32x128xbf16, #tpu.memory_space<vmem>>, vector<32x128xbf16>
    %cst_26 = arith.constant dense<0.000000e+00> : vector<16x128xf32>
    %34 = tpu.matmul %32, %33, %cst_26 {dimension_numbers = #tpu.dot_dimension_numbers<[1], [0], [0], [1], [0, 0, 1, 1], [], []>} : vector<16x32xbf16>, vector<32x128xbf16>, vector<16x128xf32> -> vector<16x128xf32>
    %c0_27 = arith.constant 0 : index
    %c0_28 = arith.constant 0 : index
    %35 = vector.load %arg11[%c0_27, %c0_28] : memref<1x128xf32, #tpu.memory_space<vmem>>, vector<1x128xf32>
    %36 = vector.broadcast %35 : vector<1x128xf32> to vector<16x128xf32>
    %37 = arith.addf %34, %36 : vector<16x128xf32>
    %38 = tpu.iota {dimensions = array<i32: 1>} : vector<16x128xi32>
    %c4_i32 = arith.constant 4 : i32
    %39 = vector.broadcast %c4_i32 : i32 to vector<16x128xi32>
    %40 = arith.cmpi sge, %38, %39 : vector<16x128xi32>
    %c8_i32 = arith.constant 8 : i32
    %41 = vector.broadcast %c8_i32 : i32 to vector<16x128xi32>
    %42 = arith.cmpi slt, %38, %41 : vector<16x128xi32>
    %43 = arith.andi %40, %42 : vector<16x128xi1>
    %cst_29 = arith.constant -2.000000e+01 : f32
    %cst_30 = arith.constant 2.000000e+00 : f32
    %44 = vector.broadcast %cst_29 : f32 to vector<16x128xf32>
    %45 = arith.maximumf %44, %37 : vector<16x128xf32>
    %46 = vector.broadcast %cst_30 : f32 to vector<16x128xf32>
    %47 = arith.minimumf %46, %45 : vector<16x128xf32>
    %48 = arith.select %43, %47, %37 : vector<16x128xi1>, vector<16x128xf32>
    %49 = arith.truncf %48 : vector<16x128xf32> to vector<16x128xbf16>
    %c0_31 = arith.constant 0 : index
    %c0_32 = arith.constant 0 : index
    %50 = vector.load %arg12[%c0_31, %c0_32] : memref<16x128xbf16, #tpu.memory_space<vmem>>, vector<16x128xbf16>
    tpu.vector_store %arg12[%c0_31, %c0_32], %49 {strides = array<i32>} : memref<16x128xbf16, #tpu.memory_space<vmem>>, vector<16x128xbf16>,
    return
  }
  func.func @transform_0(%arg0: i32) -> (i32, i32) {
    %c0_i32 = arith.constant 0 : i32
    %c0_i32_0 = arith.constant 0 : i32
    return %arg0, %c0_i32 : i32, i32
  }
  func.func @transform_1(%arg0: i32) -> (i32, i32) {
    %c0_i32 = arith.constant 0 : i32
    %c0_i32_0 = arith.constant 0 : i32
    %c0_i32_1 = arith.constant 0 : i32
    return %c0_i32, %c0_i32_0 : i32, i32
  }
  func.func @transform_2(%arg0: i32) -> (i32, i32) {
    %c0_i32 = arith.constant 0 : i32
    %c0_i32_0 = arith.constant 0 : i32
    %c0_i32_1 = arith.constant 0 : i32
    return %c0_i32, %c0_i32_0 : i32, i32
  }
  func.func @transform_3(%arg0: i32) -> (i32, i32) {
    %c0_i32 = arith.constant 0 : i32
    %c0_i32_0 = arith.constant 0 : i32
    %c0_i32_1 = arith.constant 0 : i32
    return %c0_i32, %c0_i32_0 : i32, i32
  }
  func.func @transform_4(%arg0: i32) -> (i32, i32) {
    %c0_i32 = arith.constant 0 : i32
    %c0_i32_0 = arith.constant 0 : i32
    %c0_i32_1 = arith.constant 0 : i32
    return %c0_i32, %c0_i32_0 : i32, i32
  }
  func.func @transform_5(%arg0: i32) -> (i32, i32) {
    %c0_i32 = arith.constant 0 : i32
    %c0_i32_0 = arith.constant 0 : i32
    %c0_i32_1 = arith.constant 0 : i32
    return %c0_i32, %c0_i32_0 : i32, i32
  }
  func.func @transform_6(%arg0: i32) -> (i32, i32) {
    %c0_i32 = arith.constant 0 : i32
    %c0_i32_0 = arith.constant 0 : i32
    %c0_i32_1 = arith.constant 0 : i32
    return %c0_i32, %c0_i32_0 : i32, i32
  }
  func.func @transform_7(%arg0: i32) -> (i32, i32) {
    %c0_i32 = arith.constant 0 : i32
    %c0_i32_0 = arith.constant 0 : i32
    %c0_i32_1 = arith.constant 0 : i32
    return %c0_i32, %c0_i32_0 : i32, i32
  }
  func.func @transform_8(%arg0: i32) -> (i32, i32) {
    %c0_i32 = arith.constant 0 : i32
    %c0_i32_0 = arith.constant 0 : i32
    %c0_i32_1 = arith.constant 0 : i32
    return %c0_i32, %c0_i32_0 : i32, i32
  }
  func.func @transform_9(%arg0: i32) -> (i32, i32) {
    %c0_i32 = arith.constant 0 : i32
    %c0_i32_0 = arith.constant 0 : i32
    %c0_i32_1 = arith.constant 0 : i32
    return %c0_i32, %c0_i32_0 : i32, i32
  }
  func.func @transform_10(%arg0: i32) -> (i32, i32) {
    %c0_i32 = arith.constant 0 : i32
    %c0_i32_0 = arith.constant 0 : i32
    %c0_i32_1 = arith.constant 0 : i32
    return %c0_i32, %c0_i32_0 : i32, i32
  }
  func.func @transform_11(%arg0: i32) -> (i32, i32) {
    %c0_i32 = arith.constant 0 : i32
    %c0_i32_0 = arith.constant 0 : i32
    return %arg0, %c0_i32 : i32, i32
  }
}

</mosaic_0001>

<bundles_post_ra>
// kernel: policy_forward.1
= control target key start
LH: loop header
LB: loop body
LE: loop exit
PB: predicated region body
PF: predicated region fallthrough
CT: control target
= control target key end

     0   :  { %16 = vsyncpa [#allocation3], 0  ;;  %s967_s0 = inlined_call_operand.vmem [shape: bf16[16,8], index: 0, kind: input, shape index: {}]   ;;  %s968_s1 = inlined_call_operand.hbm [shape: bf16[8,32], index: 1, kind: input, shape index: {}]   ;;  %s969_s2 = inlined_call_operand.hbm [shape: f32[1,32], index: 2, kind: input, shape index: {}]   ;;  %s970_s3 = inlined_call_operand.vmem [shape: bf16[32,32], index: 3, kind: input, shape index: {}]   ;;  %s971_s4 = inlined_call_operand.hbm [shape: f32[1,32], index: 4, kind: input, shape index: {}]   ;;  %s972_s5 = inlined_call_operand.vmem [shape: bf16[32,32], index: 5, kind: input, shape index: {}]   ;;  %s973_s6 = inlined_call_operand.hbm [shape: f32[1,32], index: 6, kind: input, shape index: {}]   ;;  %s974_s7 = inlined_call_operand.hbm [shape: bf16[32,32], index: 7, kind: input, shape index: {}]   ;;  %s975_s8 = inlined_call_operand.hbm [shape: f32[1,32], index: 8, kind: input, shape index: {}]   ;;  %s976_s9 = inlined_call_operand.vmem [shape: bf16[32,128], index: 9, kind: input, shape index: {}]   ;;  %s977_s10 = inlined_call_operand.hbm [shape: f32[1,128], index: 10, kind: input, shape index: {}]   ;;  %s978_s11 = inlined_call_operand.vmem [shape: bf16[16,128], index: 11, kind: output, shape index: {}]  }
   0x1   :  { %17 = vsyncpa [#allocation5], 0 }
   0x2   :  { %18 = vsyncpa [#allocation8], 0 }
   0x3   :  { %19 = vsyncpa [#allocation11], 0  ;;  %s758_s17 = smov [#allocation4]   ;;  %s759_s19 = smov [#allocation7]  }
   0x4   :  { %s38_s18 = sshll.u32 %s758_s17, 4  ;;  %s62_s20 = sshll.u32 %s759_s19, 4  ;;  %s39_s18 = int_to_ptr.vmem [resolvable:$true] %s38_s18  ;;  %s63_s20 = int_to_ptr.vmem [resolvable:$true] %s62_s20 }
   0x5   :  { %s596_s23 = scalar_lea.hbm %s969_s2, 16 }
   0x6   :  { %p597_p0 = scmp.ne.s32.totalorder %s969_s2, %s596_s23  ;;  %p600_p1 = scmp.lt.u32.totalorder %s596_s23, %s969_s2 }
   0x8   :  { %p602_p2 = pnand %p600_p1, %p597_p0 }
   0xa   :  { %605 = shalt.err (!%p602_p2)
}
   0xb   :  { %s606_s28 = scalar_lea.vmem %s39_s18, 16  ;;  %s610_s29 = scalar_lea.vmem %s39_s18, 32 }
   0xc   :  { %p607_p3 = scmp.ne.s32.totalorder %s39_s18, %s606_s28  ;;  %p611_p4 = scmp.lt.s32.totalorder %s39_s18, %s39_s18 }
   0xd   :  { %p612_p5 = scmp.lt.s32.totalorder %s610_s29, %s606_s28 }
   0xf   :  { %p613_p6 = por %p612_p5, %p611_p4 }
  0x11   :  { %p614_p7 = pnand %p613_p6, %p607_p3 }
  0x13   :  { %617 = shalt.err (!%p614_p7)
}
  0x14   :  { %41 = dma.hbm_to_vmem [thread:$0]  %s969_s2, 16, %s39_s18, [#allocation5]  }
  0x15   :  { %s618_s15 = scalar_lea.hbm %s973_s6, 16 }
  0x16   :  { %p619_p8 = scmp.ne.s32.totalorder %s973_s6, %s618_s15  ;;  %p622_p9 = scmp.lt.u32.totalorder %s618_s15, %s973_s6 }
  0x18   :  { %p624_p10 = pnand %p622_p9, %p619_p8 }
  0x1a   :  { %627 = shalt.err (!%p624_p10)
}
  0x1b   :  { %s628_s22 = scalar_lea.vmem %s63_s20, 16  ;;  %s632_s23 = scalar_lea.vmem %s63_s20, 32 }
  0x1c   :  { %p629_p11 = scmp.ne.s32.totalorder %s63_s20, %s628_s22  ;;  %p633_p12 = scmp.lt.s32.totalorder %s63_s20, %s63_s20 }
  0x1d   :  { %p634_p13 = scmp.lt.s32.totalorder %s632_s23, %s628_s22 }
  0x1f   :  { %p635_p0 = por %p634_p13, %p633_p12 }
  0x21   :  { %p636_p1 = pnand %p635_p0, %p629_p11 }
  0x23   :  { %639 = shalt.err (!%p636_p1)
}
  0x24   :  { %65 = dma.hbm_to_vmem [thread:$0]  %s973_s6, 16, %s63_s20, [#allocation8]  }
  0x25   :  { %s760_s24 = smov [#allocation10]   ;;  %s761_s26 = smov [#allocation2]  }
  0x26   :  { %s84_s25 = sshll.u32 %s760_s24, 4  ;;  %s28_s27 = sshll.u32 %s761_s26, 4  ;;  %s85_s25 = int_to_ptr.vmem [resolvable:$true] %s84_s25  ;;  %s29_s27 = int_to_ptr.vmem [resolvable:$true] %s28_s27 }
  0x27   :  { %s640_s30 = scalar_lea.hbm %s975_s8, 16 }
  0x28   :  { %p641_p2 = scmp.ne.s32.totalorder %s975_s8, %s640_s30  ;;  %p644_p3 = scmp.lt.u32.totalorder %s640_s30, %s975_s8 }
  0x2a   :  { %p646_p4 = pnand %p644_p3, %p641_p2 }
  0x2c   :  { %649 = shalt.err (!%p646_p4)
}
  0x2d   :  { %s650_s6 = scalar_lea.vmem %s85_s25, 16  ;;  %s654_s20 = scalar_lea.vmem %s85_s25, 32 }
  0x2e   :  { %p651_p5 = scmp.ne.s32.totalorder %s85_s25, %s650_s6  ;;  %p655_p6 = scmp.lt.s32.totalorder %s85_s25, %s85_s25 }
  0x2f   :  { %p656_p7 = scmp.lt.s32.totalorder %s654_s20, %s650_s6 }
  0x31   :  { %p657_p8 = por %p656_p7, %p655_p6 }
  0x33   :  { %p658_p9 = pnand %p657_p8, %p651_p5 }
  0x35   :  { %661 = shalt.err (!%p658_p9)
}
  0x36   :  { %87 = dma.hbm_to_vmem [thread:$0]  %s975_s8, 16, %s85_s25, [#allocation11]  }
  0x37   :  { %s662_s22 = scalar_lea.hbm %s968_s1, 64 }
  0x38   :  { %p663_p10 = scmp.ne.s32.totalorder %s968_s1, %s662_s22  ;;  %p666_p11 = scmp.lt.u32.totalorder %s662_s22, %s968_s1 }
  0x3a   :  { %p668_p12 = pnand %p666_p11, %p663_p10 }
  0x3c   :  { %671 = shalt.err (!%p668_p12)
}
  0x3d   :  { %s672_s26 = scalar_lea.vmem %s29_s27, 64  ;;  %p677_p0 = scmp.lt.s32.totalorder %s29_s27, %s29_s27 }
  0x3e   :  { %p673_p13 = scmp.ne.s32.totalorder %s29_s27, %s672_s26  ;;  %p678_p1 = scmp.lt.s32.totalorder %s672_s26, %s672_s26 }
  0x40   :  { %p679_p2 = por %p678_p1, %p677_p0 }
  0x42   :  { %p680_p3 = pnand %p679_p2, %p673_p13 }
  0x44   :  { %683 = shalt.err (!%p680_p3)
}
  0x45   :  { %31 = dma.hbm_to_vmem [thread:$0]  %s968_s1, 64, %s29_s27, [#allocation3]  }
  0x46   :  { %s762_s28 = smov [#allocation6]   ;;  %s763_s30 = smov [#allocation9]  }
  0x47   :  { %s50_s29 = sshll.u32 %s762_s28, 4  ;;  %s71_s12 = sshll.u32 %s763_s30, 4  ;;  %s51_s29 = int_to_ptr.vmem [resolvable:$true] %s50_s29  ;;  %s877_s12 = int_to_ptr.vmem [resolvable:$true] %s71_s12 }
  0x48   :  { %s684_s15 = scalar_lea.hbm %s971_s4, 16 }
  0x49   :  { %p685_p4 = scmp.ne.s32.totalorder %s971_s4, %s684_s15  ;;  %p688_p5 = scmp.lt.u32.totalorder %s684_s15, %s971_s4 }
  0x4b   :  { %p690_p6 = pnand %p688_p5, %p685_p4 }
  0x4d   :  { %693 = shalt.err (!%p690_p6)
}
  0x4e   :  { %s694_s1 = scalar_lea.vmem %s51_s29, 16  ;;  %s698_s27 = scalar_lea.vmem %s51_s29, 32 }
  0x4f   :  { %p695_p7 = scmp.ne.s32.totalorder %s51_s29, %s694_s1  ;;  %p699_p8 = scmp.lt.s32.totalorder %s51_s29, %s51_s29 }
  0x50   :  { %p700_p9 = scmp.lt.s32.totalorder %s698_s27, %s694_s1 }
  0x52   :  { %p701_p10 = por %p700_p9, %p699_p8 }
  0x54   :  { %p702_p11 = pnand %p701_p10, %p695_p7 }
  0x56   :  { %705 = shalt.err (!%p702_p11)
}
  0x57   :  { %53 = dma.hbm_to_vmem [thread:$0]  %s971_s4, 16, %s51_s29, [#allocation5]  }
  0x58   :  { %s706_s2 = scalar_lea.hbm %s974_s7, 256 }
  0x59   :  { %p707_p12 = scmp.ne.s32.totalorder %s974_s7, %s706_s2  ;;  %p710_p13 = scmp.lt.u32.totalorder %s706_s2, %s974_s7 }
  0x5b   :  { %p712_p0 = pnand %p710_p13, %p707_p12 }
  0x5d   :  { %715 = shalt.err (!%p712_p0)
}
  0x5e   :  { %s716_s25 = scalar_lea.vmem %s877_s12, 256  ;;  %p721_p2 = scmp.lt.s32.totalorder %s877_s12, %s877_s12 }
  0x5f   :  { %p717_p1 = scmp.ne.s32.totalorder %s877_s12, %s716_s25  ;;  %p722_p3 = scmp.lt.s32.totalorder %s716_s25, %s716_s25 }
  0x61   :  { %p723_p4 = por %p722_p3, %p721_p2 }
  0x63   :  { %p724_p5 = pnand %p723_p4, %p717_p1 }
  0x65   :  { %727 = shalt.err (!%p724_p5)
}
  0x66   :  { %s764_s4 = smov 64   ;;  %s765_s28 = smov 4  }
  0x67   :  { %77 = dma.hbm_to_vmem [thread:$0]  %s974_s7, 256, %s877_s12, [#allocation8], %s764_s4, %s764_s4, %s765_s28  }
  0x68   :  { %s766_s13 = smov [#allocation12]   ;;  %s728_s20 = scalar_lea.hbm %s977_s10, 16 }
  0x69   :  { %s96_s14 = sshll.u32 %s766_s13, 4  ;;  %p729_p6 = scmp.ne.s32.totalorder %s977_s10, %s728_s20  ;;  %s97_s14 = int_to_ptr.vmem [resolvable:$true] %s96_s14 }
  0x6a   :  { %p732_p7 = scmp.lt.u32.totalorder %s728_s20, %s977_s10 }
  0x6c   :  { %p734_p8 = pnand %p732_p7, %p729_p6 }
  0x6e   :  { %737 = shalt.err (!%p734_p8)
}
  0x6f   :  { %s738_s19 = scalar_lea.vmem %s97_s14, 16  ;;  %s742_s7 = scalar_lea.vmem %s97_s14, 32 }
  0x70   :  { %p739_p9 = scmp.ne.s32.totalorder %s97_s14, %s738_s19  ;;  %p743_p10 = scmp.lt.s32.totalorder %s97_s14, %s97_s14 }
  0x71   :  { %p744_p11 = scmp.lt.s32.totalorder %s742_s7, %s738_s19 }
  0x73   :  { %p745_p12 = por %p744_p11, %p743_p10 }
  0x75   :  { %p746_p13 = pnand %p745_p12, %p739_p9 }
  0x77   :  { %749 = shalt.err (!%p746_p13)
}
  0x78   :  { %99 = dma.hbm_to_vmem [thread:$0]  %s977_s10, 16, %s97_s14, [#allocation11]  }
  0x79   :  { %750 = dma.done.wait [#allocation3], 64  }
  0x7a   :  { %751 = vsyncadd [#allocation3], 4294967232 }
  0x7b   :  { %752 = dma.done.wait [#allocation5], 32  }
  0x7c   :  { %753 = vsyncadd [#allocation5], 4294967264 }
  0x7d   :  { %754 = dma.done.wait [#allocation8], 272  }
  0x7e   :  { %755 = vsyncadd [#allocation8], 4294967024 }
  0x7f   :  { %756 = dma.done.wait [#allocation11], 32  }
  0x80   :  { %757 = vsyncadd [#allocation11], 4294967264  ;;  %v767_v0 = vmov 0.0   ;;  %vm768_vm0 = vmmov 0   ;;  %vm141_vm1 = vcmask 1043456   ;;  %v587_v3 = vld [vmem:[%s967_s0] sm:$0xff]   ;;  %v467_v52 = vlaneseq }
  0x81   :  { %538 = vmatprep.subr.bf16.mxu0 %v767_v0  ;;  %540 = vmatprep.mubr.msk.bf16.mxu0 %vm768_vm0, %v767_v0  ;;  %v124_v1 = vld [vmem:[#allocation2] sm:$0xf]  ;;  %vm137_vm2 = vcmask 64512   ;;  %v588_v4 = vld [vmem:[%s970_s3] sm:$0xff]   ;;  %v589_v5 = vld [vmem:[%s970_s3 + $0x8] sm:$0xff]   ;;  %vm212_vm3 = vcmask 261120  }
  0x82   :  { %544 = vmatprep.subr.bf16.mxu1 %v767_v0  ;;  %548 = vmatprep.mubr.msk.bf16.mxu1 %vm768_vm0, %v767_v0  ;;  %v143_v2 = vsel %vm141_vm1, %v124_v1, 0  ;;  %v496_v6 = vld [vmem:[#allocation4] ss:$0 sm:$0xff]  ;;  %v590_v16 = vld [vmem:[%s972_s5] sm:$0xff]   ;;  %v591_v17 = vld [vmem:[%s972_s5 + $0x8] sm:$0xff]   ;;  %v468_v54 = vand.u32 127, %v467_v52 }
  0x83   :  { %539 = vmatpush3.bf16.msra.mxu0 %v143_v2  ;;  %545 = vmatpush3.bf16.msra.mxu1 %v588_v4  ;;  %v499_v18 = vld [vmem:[#allocation6] ss:$0 sm:$0xff]  ;;  %v592_v28 = vld [vmem:[#allocation9] sm:$0xff]   ;;  %v593_v29 = vld [vmem:[#allocation9 + $0x8] sm:$0xff]  }
  0x84   :  { %552 = vmatprep.subr.bf16.mxu0 %v767_v0  ;;  %546 = vmatprep.subr.bf16.mxu1 %v767_v0  ;;  %v503_v30 = vld [vmem:[#allocation7] ss:$0 sm:$0xff]  ;;  %v594_v40 = vld [vmem:[%s976_s9] sm:$0xff]   ;;  %v595_v41 = vld [vmem:[%s976_s9 + $0x8] sm:$0xff]   ;;  %vm469_vm4 = vcmp.ge.s32.totalorder %v468_v54, 4  ;;  %vm470_vm5 = vcmp.lt.s32.totalorder %v468_v54, 8 }
  0x85   :  { %v507_v42 = vld [vmem:[#allocation10] ss:$0 sm:$0xff]  ;;  %v511_v53 = vld [vmem:[#allocation12] ss:$0 sm:$0xff]  ;;  %vm471_vm6 = vmand %vm469_vm4, %vm470_vm5 }
  0x86   :  { %541 = vmatmul.mubr.msk.bf16.vlgmr.msra.gmra.mrb[0].mxu0 %vm137_vm2, %v587_v3 }
  0x87   :  { %556 = vmatprep.mubr.msk.bf16.mxu0 %vm768_vm0, %v767_v0  ;;  %547 = vmatpush3.bf16.msra.mxu1 %v589_v5 }
  0x88   :  { %560 = vmatprep.subr.bf16.mxu1 %v767_v0  ;;  %553 = vmatpush3.bf16.msra.mxu0 %v590_v16 }
  0x89   :  { %554 = vmatprep.subr.bf16.mxu0 %v767_v0 }
  0x8c   :  { %555 = vmatpush3.bf16.msra.mxu0 %v591_v17 }
  0x8d   :  { %568 = vmatprep.subr.bf16.mxu0 %v767_v0 }
 0x159   :  { %v179_v7 = vpop.f32.mrb[0].mxu0 }
 0x15a   :  { %v180_v8 = vadd.f32 %v496_v6, %v179_v7  ;;  %v542_v9 = vpop.f32.mrb[1].mxu0 }
 0x15b   :  { %v182_v10 = vpop.f32.mrb[2].mxu0 }
 0x15c   :  { %v183_v11 = vadd.f32 %v496_v6, %v182_v10  ;;  %v543_v12 = vpop.f32.mrb[3].mxu0  ;;  %v186_v13 = vmax.f32 %v180_v8, 0.0 }
 0x15e   :  { %v187_v14 = vmax.f32 %v183_v11, 0.0 }
 0x160   :  { %v188_v15 = vpack.c.bf16 %v187_v14, %v186_v13 }
 0x162   :  { %549 = vmatmul.mubr.msk.bf16.vlgmr.msra.gmra.mrb[0].mxu1 %vm212_vm3, %v188_v15 }
 0x163   :  { %564 = vmatprep.mubr.msk.bf16.mxu1 %vm768_vm0, %v767_v0  ;;  %561 = vmatpush3.bf16.msra.mxu1 %v592_v28 }
 0x164   :  { %562 = vmatprep.subr.bf16.mxu1 %v767_v0 }
 0x167   :  { %563 = vmatpush3.bf16.msra.mxu1 %v593_v29 }
 0x235   :  { %v250_v19 = vpop.f32.mrb[0].mxu1 }
 0x236   :  { %v251_v20 = vadd.f32 %v499_v18, %v250_v19  ;;  %v550_v21 = vpop.f32.mrb[1].mxu1 }
 0x237   :  { %v253_v22 = vpop.f32.mrb[2].mxu1 }
 0x238   :  { %v254_v23 = vadd.f32 %v499_v18, %v253_v22  ;;  %v551_v24 = vpop.f32.mrb[3].mxu1  ;;  %v257_v25 = vmax.f32 %v251_v20, 0.0 }
 0x23a   :  { %v258_v26 = vmax.f32 %v254_v23, 0.0 }
 0x23c   :  { %v259_v27 = vpack.c.bf16 %v258_v26, %v257_v25 }
 0x23e   :  { %557 = vmatmul.mubr.msk.bf16.vlgmr.msra.gmra.mrb[4].mxu0 %vm212_vm3, %v259_v27 }
 0x23f   :  { %572 = vmatprep.mubr.msk.bf16.mxu0 %vm768_vm0, %v767_v0  ;;  %569 = vmatpush3.bf16.msra.mxu0 %v594_v40 }
 0x240   :  { %570 = vmatprep.subr.bf16.mxu0 %v767_v0 }
 0x243   :  { %571 = vmatpush3.bf16.msra.mxu0 %v595_v41 }
 0x311   :  { %v320_v31 = vpop.f32.mrb[4].mxu0 }
 0x312   :  { %v321_v32 = vadd.f32 %v503_v30, %v320_v31  ;;  %v558_v33 = vpop.f32.mrb[5].mxu0 }
 0x313   :  { %v323_v34 = vpop.f32.mrb[6].mxu0 }
 0x314   :  { %v324_v35 = vadd.f32 %v503_v30, %v323_v34  ;;  %v559_v36 = vpop.f32.mrb[7].mxu0  ;;  %v327_v37 = vmax.f32 %v321_v32, 0.0 }
 0x316   :  { %v328_v38 = vmax.f32 %v324_v35, 0.0 }
 0x318   :  { %v329_v39 = vpack.c.bf16 %v328_v38, %v327_v37 }
 0x31a   :  { %565 = vmatmul.mubr.msk.bf16.vlgmr.msra.gmra.mrb[4].mxu1 %vm212_vm3, %v329_v39 }
 0x3ed   :  { %v390_v43 = vpop.f32.mrb[4].mxu1 }
 0x3ee   :  { %v391_v44 = vadd.f32 %v507_v42, %v390_v43  ;;  %v566_v45 = vpop.f32.mrb[5].mxu1 }
 0x3ef   :  { %v393_v46 = vpop.f32.mrb[6].mxu1 }
 0x3f0   :  { %v394_v47 = vadd.f32 %v507_v42, %v393_v46  ;;  %v567_v48 = vpop.f32.mrb[7].mxu1  ;;  %v397_v49 = vmax.f32 %v391_v44, 0.0 }
 0x3f2   :  { %v398_v50 = vmax.f32 %v394_v47, 0.0 }
 0x3f4   :  { %v399_v51 = vpack.c.bf16 %v398_v50, %v397_v49 }
 0x3f6   :  { %573 = vmatmul.mubr.msk.bf16.vlgmr.msra.gmra.mrb[8].mxu0 %vm212_vm3, %v399_v51 }
 0x4c9   :  { %v460_v55 = vpop.f32.mrb[8].mxu0 }
 0x4ca   :  { %v461_v56 = vadd.f32 %v511_v53, %v460_v55  ;;  %v574_v57 = vpop.f32.mrb[9].mxu0 }
 0x4cb   :  { %v463_v58 = vpop.f32.mrb[10].mxu0 }
 0x4cc   :  { %v472_v59 = vmax.f32 %v461_v56, -20.0  ;;  %v464_v60 = vadd.f32 %v511_v53, %v463_v58  ;;  %v575_v61 = vpop.f32.mrb[11].mxu0 }
 0x4ce   :  { %v474_v62 = vmin.f32 %v472_v59, 2.0  ;;  %v473_v63 = vmax.f32 %v464_v60, -20.0 }
 0x4d0   :  { %v475_v0 = vmin.f32 %v473_v63, 2.0  ;;  %v476_v1 = vsel %vm471_vm6, %v474_v62, %v461_v56 }
 0x4d2   :  { %v477_v2 = vsel %vm471_vm6, %v475_v0, %v464_v60 }
 0x4d3   :  { %v522_v3 = vpack.c.bf16 %v477_v2, %v476_v1 }
 0x4d5   :  { %523 = vst [vmem:[%s978_s11] sm:$0xff] %v522_v3  }
 0x4d6   :  { %492 = vsyncpa [#allocation3], 1 }
 0x4d7   :  { %493 = vsyncpa [#allocation5], 1 }
 0x4d8   :  { %494 = vsyncpa [#allocation8], 1 }
 0x4d9   :  { %495 = vsyncpa [#allocation11], 1 }

</bundles_post_ra>
